<compile_context>
chip_gen: v7x
topology: tpu7x:2x2x1
jax: 0.10.0
libtpu: 0.0.40
codegen_flags: <defaults>
</compile_context>

<pallas_src>
import jax
import jax.numpy as jnp
from jax.experimental import pallas as pl
from jax.experimental.pallas import tpu as pltpu


def _round_up(x, m):
    return ((x + m - 1) // m) * m


def _sublane_pack(itemsize):
    # Sub-32-bit dtypes pack along sublanes: keep channel tiles a multiple of
    # the packed sublane count so VMEM blocks stay dense.
    if itemsize >= 4:
        return 8
    if itemsize == 2:
        return 16
    return 32


def _block_bytes(g, c_tile, hw_tile, itemsize, sub):
    """Physical VMEM bytes of one (in + out) block pair, incl. sublane padding."""
    hw_p = _round_up(hw_tile, 128)
    in_b = g * _round_up(c_tile, sub) * hw_p * itemsize           # (g, c_tile, hw)
    out_b = c_tile * _round_up(g, sub) * hw_p * itemsize          # (c_tile, g, hw)
    return in_b + out_b


def _choose_tiles(g, cpg, hw, itemsize, pipeline_budget_bytes):
    """Pick (c_tile, hw_tile) for blocks (g, c_tile, hw_tile) / (c_tile, g, hw_tile).

    c_tile is a multiple of the packed-sublane count (or the full cpg);
    hw_tile is the full HW or a multiple of 128 -- both choices are always
    legal.  Aims for the largest block whose double-buffered in+out footprint
    fits the VMEM budget.
    """
    sub = _sublane_pack(itemsize)
    g_p = _round_up(g, sub)
    budget = max(pipeline_budget_bytes // 2, 1)       # 2 pipeline buffers
    hw_p = _round_up(hw, 128)

    # Whole (g, cpg, HW) slab per batch element if it fits.
    if _block_bytes(g, cpg, hw, itemsize, sub) <= budget:
        return cpg, hw

    # Keep the lane axis full (contiguous DMA runs); shrink the channel axis in
    # multiples of the sublane pack.
    per_c = hw_p * itemsize * (g + g_p)
    c_tile = (budget // per_c) // sub * sub
    if c_tile >= sub:
        return min(c_tile, cpg), hw

    # Channel axis at its legal minimum; shrink HW in multiples of 128.
    c_tile = cpg if cpg < sub else sub
    if hw <= 128:
        return c_tile, hw
    per_hw = itemsize * (g * _round_up(c_tile, sub) + c_tile * g_p)
    hw_tile = (budget // per_hw) // 128 * 128
    return c_tile, max(min(hw_tile, hw), 128)


def _shuffle_kernel(x_ref, o_ref):
    # x_ref: (g, c_tile, hw_tile) block of x viewed as (N, g, C//g, H*W).
    # o_ref: (c_tile, g, hw_tile) block of out viewed as (N, C//g, g, H*W).
    # The (g, c) -> (c, g) swap is pure sublane work inside VMEM; the lane (HW)
    # axis and both HBM-side DMAs stay dense and contiguous.
    for j in range(x_ref.shape[0]):           # g is small & static -> unrolled
        o_ref[:, j, :] = x_ref[j, :, :]


def shuffle_block(x, groups=2, *, vmem_budget_bytes=8 * 1024 * 1024):
    """Channel shuffle, NCHW layout, matching the PyTorch ShuffleBlock."""
    N, C, H, W = x.shape
    g = int(groups)
    assert C % g == 0, "channels must be divisible by groups"
    cpg = C // g
    if g == 1 or cpg == 1:
        return x                               # shuffle is the identity
    HW = H * W
    itemsize = jnp.dtype(x.dtype).itemsize

    c_tile, hw_tile = _choose_tiles(g, cpg, HW, itemsize, vmem_budget_bytes)

    # v7x megacore: with N == 1 keep a splittable "parallel" axis of extent >= 2
    # so both TensorCores share the copy (they share HBM BW, but overlap better).
    if N == 1 and pl.cdiv(cpg, c_tile) == 1 and pl.cdiv(HW, hw_tile) == 1:
        sub = _sublane_pack(itemsize)
        if c_tile >= 2 * sub:
            c_tile = _round_up(c_tile // 2, sub)
        elif hw_tile % 256 == 0:
            hw_tile //= 2

    n_c = pl.cdiv(cpg, c_tile)
    n_hw = pl.cdiv(HW, hw_tile)

    x4 = x.reshape(N, g, cpg, HW)              # metadata-only reshape

    out = pl.pallas_call(
        _shuffle_kernel,
        out_shape=jax.ShapeDtypeStruct((N, cpg, g, HW), x.dtype),
        grid=(N, n_c, n_hw),
        in_specs=[pl.BlockSpec((None, g, c_tile, hw_tile),
                               lambda n, ci, ti: (n, 0, ci, ti))],
        out_specs=pl.BlockSpec((None, c_tile, g, hw_tile),
                               lambda n, ci, ti: (n, ci, 0, ti)),
        compiler_params=pltpu.CompilerParams(
            dimension_semantics=("parallel", "parallel", "parallel")),
        cost_estimate=pl.CostEstimate(
            flops=0, transcendentals=0,
            bytes_accessed=2 * N * C * HW * itemsize),
    )(x4)

    # Free reshape back to NCHW; flat channel over (i, j) is i*g + j, exactly
    # PyTorch's permute(0, 2, 1, 3, 4).reshape(N, C, H, W).
    return out.reshape(N, C, H, W)


def shuffle_block_ref(x, groups=2):
    """Pure-JAX reference implementation (mirrors the PyTorch forward)."""
    N, C, H, W = x.shape
    g = groups
    return (x.reshape(N, g, C // g, H, W)
             .transpose(0, 2, 1, 3, 4)
             .reshape(N, C, H, W))


if __name__ == "__main__":
    root = jax.random.PRNGKey(0)

    cases = [
        # (shape, groups, extra kwargs)
        ((2, 4, 16, 16), 2, {}),                                    # aligned HW (256)
        ((1, 12, 7, 7), 3, {}),                                     # tiny odd HW, N == 1
        ((2, 8, 14, 14), 4, dict(vmem_budget_bytes=16 * 1024)),     # forced HW tiling + ragged edge
        ((1, 32, 8, 8), 2, {}),                                     # N == 1 megacore split path
    ]

    for idx, (shape, g, kw) in enumerate(cases):
        key = jax.random.fold_in(root, idx)
        x = jax.random.normal(key, shape, dtype=jnp.float32)
        out = jax.block_until_ready(shuffle_block(x, groups=g, **kw))
        ref = shuffle_block_ref(x, groups=g)
        assert out.shape == x.shape, f"shape mismatch for case {idx}"
        assert out.dtype == x.dtype, f"dtype mismatch for case {idx}"
        assert bool(jnp.all(out == ref)), f"value mismatch for case {idx}: {shape}, g={g}"

    print("KERNEL_OK")
</pallas_src>

<mosaic_0001>
module attributes {stable_mosaic.version = 11 : i64} {
  func.func @_shuffle_kernel(%arg0: i32, %arg1: i32, %arg2: i32, %arg3: memref<1x2x2x256xf32, #tpu.memory_space<vmem>>, %arg4: memref<1x2x2x256xf32, #tpu.memory_space<vmem>>) attributes {dimension_semantics = [#tpu.dimension_semantics<parallel>, #tpu.dimension_semantics<parallel>, #tpu.dimension_semantics<parallel>], iteration_bounds = array<i64: 2, 1, 1>, scalar_prefetch = 0 : i64, scratch_operands = 0 : i64, tpu.core_type = #tpu.core_type<tc>, window_params = [{transform_indices = @transform_0, window_bounds = array<i64: 1, 2, 2, 256>}, {transform_indices = @transform_1, window_bounds = array<i64: 1, 2, 2, 256>}]} {
    %c0 = arith.constant 0 : index
    %c0_0 = arith.constant 0 : index
    %c0_1 = arith.constant 0 : index
    %c0_2 = arith.constant 0 : index
    %0 = vector.load %arg3[%c0, %c0_0, %c0_1, %c0_2] : memref<1x2x2x256xf32, #tpu.memory_space<vmem>>, vector<1x1x2x256xf32>
    %1 = vector.shape_cast %0 : vector<1x1x2x256xf32> to vector<2x256xf32>
    %c0_3 = arith.constant 0 : index
    %c0_4 = arith.constant 0 : index
    %c0_5 = arith.constant 0 : index
    %c0_6 = arith.constant 0 : index
    %2 = vector.load %arg4[%c0_3, %c0_4, %c0_5, %c0_6] : memref<1x2x2x256xf32, #tpu.memory_space<vmem>>, vector<1x2x1x256xf32>
    %3 = vector.shape_cast %2 : vector<1x2x1x256xf32> to vector<2x256xf32>
    %4 = vector.shape_cast %1 : vector<2x256xf32> to vector<1x2x1x256xf32>
    tpu.vector_store %arg4[%c0_3, %c0_4, %c0_5, %c0_6], %4 {strides = array<i32>} : memref<1x2x2x256xf32, #tpu.memory_space<vmem>>, vector<1x2x1x256xf32>,
    %c0_7 = arith.constant 0 : index
    %c1 = arith.constant 1 : index
    %c0_8 = arith.constant 0 : index
    %c0_9 = arith.constant 0 : index
    %5 = vector.load %arg3[%c0_7, %c1, %c0_8, %c0_9] : memref<1x2x2x256xf32, #tpu.memory_space<vmem>>, vector<1x1x2x256xf32>
    %6 = vector.shape_cast %5 : vector<1x1x2x256xf32> to vector<2x256xf32>
    %c0_10 = arith.constant 0 : index
    %c0_11 = arith.constant 0 : index
    %c1_12 = arith.constant 1 : index
    %c0_13 = arith.constant 0 : index
    %7 = vector.load %arg4[%c0_10, %c0_11, %c1_12, %c0_13] : memref<1x2x2x256xf32, #tpu.memory_space<vmem>>, vector<1x2x1x256xf32>
    %8 = vector.shape_cast %7 : vector<1x2x1x256xf32> to vector<2x256xf32>
    %9 = vector.shape_cast %6 : vector<2x256xf32> to vector<1x2x1x256xf32>
    tpu.vector_store %arg4[%c0_10, %c0_11, %c1_12, %c0_13], %9 {strides = array<i32>} : memref<1x2x2x256xf32, #tpu.memory_space<vmem>>, vector<1x2x1x256xf32>,
    return
  }
  func.func @transform_0(%arg0: i32, %arg1: i32, %arg2: i32) -> (i32, i32, i32, i32) {
    %c0_i32 = arith.constant 0 : i32
    %c0_i32_0 = arith.constant 0 : i32
    return %arg0, %c0_i32, %arg1, %arg2 : i32, i32, i32, i32
  }
  func.func @transform_1(%arg0: i32, %arg1: i32, %arg2: i32) -> (i32, i32, i32, i32) {
    %c0_i32 = arith.constant 0 : i32
    %c0_i32_0 = arith.constant 0 : i32
    return %arg0, %arg1, %c0_i32, %arg2 : i32, i32, i32, i32
  }
}

</mosaic_0001>

<bundles_post_ra>
// kernel: tpu_custom_call.1
= control target key start
LH: loop header
LB: loop body
LE: loop exit
PB: predicated region body
PF: predicated region fallthrough
CT: control target
= control target key end

     0   :  { %6 = vsyncpa [#allocation3], 0  ;;  %s712_s0 = inlined_call_operand.hbm [shape: f32[2,2,2,256], index: 0, kind: input, shape index: {}]   ;;  %s713_s1 = inlined_call_operand.hbm [shape: f32[2,2,2,256], index: 1, kind: output, shape index: {}]  }
   0x1   :  { %8 = vsyncpa [#allocation3 + $0x1], 0 }
   0x2   :  { %9 = vsyncpa [#allocation4], 0 }
   0x3   :  { %11 = vsyncpa [#allocation4 + $0x1], 0  ;;  %s537_s6 = smov 0   ;;  %s539_s7 = smov 0  }
   0x4   :  { %s541_s8 = smov 0   ;;  %s543_s9 = smov 0  }
   0x5   :  { %s545_s10 = smov 0   ;;  %s547_s11 = smov 0  }
   0x6 LB: > { %s318_s12 = sadd.s32 4294967295, %s519_s11   ;;  %s319_s13 = sadd.s32 4294967294, %s519_s11   ;;  %s519_s11 = sphi %s547_s11, %s17_s11   ;;  %s515_s10 = sphi %s545_s10, %s728_s10   ;;  %s511_s9 = sphi %s543_s9, %s727_s9   ;;  %s507_s8 = sphi %s541_s8, %s726_s8   ;;  %s503_s7 = sphi %s539_s7, %s725_s7   ;;  %s499_s6 = sphi %s537_s6, %s724_s6  }
   0x7   : > { %s36_s14 = sadd.s32 1, %s515_s10  ;;  %s47_s15 = sadd.s32 1, %s507_s8 }
   0x8   : > { %p38_p0 = scmp.ge.s32.totalorder %s36_s14, 2  ;;  %p54_p1 = scmp.ne.s32.totalorder %s507_s8, %s503_s7 }
   0x9   : > { %p55_p2 = scmp.eq.s32.totalorder %s519_s11, 0  ;;  %p60_p3 = scmp.ne.s32.totalorder %s503_s7, %s499_s6 }
   0xa   : > { %s730_s14 = smov (%p38_p0, %s36_s14), 0  ;;  %p61_p5 = scmp.eq.s32.totalorder %s318_s12, 0 }
   0xb   : > { %p578_p4 = por %p55_p2, %p54_p1  ;;  %s40_s17 = ssub.s32 %s515_s10, %s730_s14 }
   0xc   : > { %p88_p6 = scmp.eq.s32.totalorder %s318_s12, 1  ;;  %p45_p7 = scmp.eq.s32.totalorder %s40_s17, 0 }
   0xd   : > { %p584_p8 = por %p61_p5, %p60_p3  ;;  %p94_p10 = scmp.eq.s32.totalorder %s319_s13, 1 }
   0xe   : > { %p588_p9 = por %p88_p6, %p54_p1  ;;  %p353_p13 = scmp.lt.s32.totalorder %s519_s11, 2 }
   0xf   : > { %s593_s20 = scalar_select %p45_p7, %s507_s8, %s47_s15  }
  0x10   : > { %s717_s19 = scalar_select %p588_p9, 1, 0 }
  0x11   : > { %p595_p11 = por %p94_p10, %p60_p3  ;;  %s114_s22 = sand.u32 1, %s507_s8  }
  0x12   : > { %s322_s23 = sshll.u32 %s114_s22, 3  ;;  %s339_s24 = sshll.u32 %s515_s10, 7 }
  0x13   : > { %s718_s21 = scalar_select %p595_p11, 1, 0 }
  0x14   : > { %s606_s27 = scalar_lea.hbm %s712_s0, %s339_s24  ;;  %s118_s28 = scalar_lea.vmem [#allocation2], %s322_s23 }
  0x15   : > { %s129_s29 = sshll.u32 %s118_s28, 4  ;;  %p612_p0 = pnand %p353_p13, %p578_p4  ;;  %s608_s29 = int_to_ptr.vmem [resolvable:$true] %s129_s29 }
  0x16   : > { %s617_s2 = scalar_lea.sflag [#allocation3], %s114_s22  ;;  %s407_s3 = scalar_lea.hbm %s606_s27, 128 }
  0x17   : > { %p408_p2 = scmp.ne.s32.totalorder %s606_s27, %s407_s3  ;;  %p409_p3 = pneg %p612_p0 }
  0x18   : > { %s412_s12 = scalar_lea.hbm %s712_s0, 256  ;;  %p413_p4 = scmp.lt.u32.totalorder %s606_s27, %s712_s0 }
  0x19   : > { %p410_p5 = pnand %p409_p3, %p408_p2  ;;  %p414_p7 = scmp.lt.u32.totalorder %s412_s12, %s407_s3 }
  0x1a   : > { %p416_p13 = scmp.lt.u32.totalorder %s407_s3, %s606_s27 }
  0x1b   : > { %p411_p6 = pneg %p410_p5  ;;  %p415_p10 = por %p414_p7, %p413_p4 }
  0x1d   : > { %p417_p12 = por %p416_p13, %p415_p10 }
  0x1f   : > { %p418_p1 = pnand %p417_p12, %p411_p6 }
  0x21   : > { %421 = shalt.err (!%p418_p1)
}
  0x22   : > { %s422_s16 = scalar_lea.vmem %s608_s29, 128  ;;  %s521_s17 = smov [#allocation2]  }
  0x23   : > { %p423_p2 = scmp.ne.s32.totalorder %s608_s29, %s422_s16  ;;  %s427_s22 = sshll.u32 %s521_s17, 4  ;;  %s428_s22 = int_to_ptr.vmem [resolvable:$false] %s427_s22 }
  0x24   : > { %s429_s23 = scalar_lea.vmem %s428_s22, 256  ;;  %p430_p9 = scmp.lt.s32.totalorder %s608_s29, %s428_s22 }
  0x25   : > { %p425_p5 = pnand %p423_p2, %p409_p3  ;;  %p431_p4 = scmp.lt.s32.totalorder %s429_s23, %s422_s16 }
  0x27   : > { %p426_p11 = pneg %p425_p5  ;;  %p432_p7 = por %p431_p4, %p430_p9 }
  0x29   : > { %p433_p10 = pnand %p432_p7, %p426_p11 }
  0x2b   : > { %436 = shalt.err (!%p433_p10)
}
  0x2c   : > { %s522_s24 = smov 64   ;;  %s523_s25 = smov 4  }
  0x2d   : > { %348 = dma.hbm_to_vmem [thread:$0]  (!%p612_p0), %s606_s27, 128, %s608_s29, %s617_s2, %s522_s24, %s522_s24, %s523_s25  }
  0x2e   : > { %p137_p12 = scmp.lt.s32.totalorder %s519_s11, 3  ;;  %p720_p1 = scmp.ge.s32.totalorder %s519_s11, 1 }
  0x30   : > { %p138_p3 = pnand %p720_p1, %p137_p12 }
  0x31   : > { %s649_s26 = sand.u32 (!%p138_p3), 1, %s503_s7  }
  0x32   : > { %141 = sbr.rel (%p138_p3) target bundleno = 86 (0x56), region = 24  ;;  %s326_s28 = sshll.u32 (!%p138_p3), %s649_s26, 3 }
  0x33   : > { %s144_s3 = scalar_lea.sflag (!%p138_p3), [#allocation3], %s649_s26  ;;  %s147_s4 = scalar_lea.vmem (!%p138_p3), [#allocation2], %s326_s28 }
  0x39   : > { %490 = dma.done.wait (%p584_p8), %s144_s3, 128  }
  0x3a   : > { %492 = vsyncadd (%p584_p8), %s144_s3, 4294967168  ;;  %v181_v0 = vlaneseq  ;;  %s165_s27 = scalar_lea.vmem [#allocation5], %s326_s28  ;;  %s340_s30 = sshll.u32 %s511_s9, 7 }
  0x3b   : > { %s224_s29 = sshll.u32 %s165_s27, 4  ;;  %v328_v1 = vld.sshfl [vmem:[%s147_s4] sm:$0x33 pattern:$0x75316420]  ;;  %s663_s5 = scalar_lea.hbm %s713_s1, %s340_s30  ;;  %s658_s29 = int_to_ptr.vmem [resolvable:$true] %s224_s29 }
  0x3c   : > { %vm183_vm0 = vcmp.lt.s32.totalorder %v181_v0, 256  ;;  %v178_v2 = vcombine.high %v328_v1, %v328_v1  ;;  %v331_v3 = vld.sshfl [vmem:[%s147_s4 + $0x4] sm:$0x33 pattern:$0x75316420]  ;;  %s206_s12 = scalar_lea.sflag [#allocation4], %s649_s26 }
  0x3d   : > { %185 = vst.msk [vmem:[%s165_s27] ss:$2 sm:$0x3] %vm183_vm0, %v328_v1  ;;  %v198_v4 = vcombine.high %v331_v3, %v331_v3  ;;  %332 = vst.msk [vmem:[%s165_s27 + $0x1] ss:$2 sm:$0x3] %vm183_vm0, %v331_v3 }
  0x3e   : > { %329 = vst.msk [vmem:[%s165_s27 + $0x4] ss:$2 sm:$0x3] %vm183_vm0, %v178_v2  ;;  %s437_s9 = scalar_lea.vmem %s658_s29, 128  ;;  %p721_p9 = scmp.ne.s32.totalorder %s717_s19, 0 }
  0x3f   : > { %333 = vst.msk [vmem:[%s165_s27 + $0x5] ss:$2 sm:$0x3] %vm183_vm0, %v198_v4  ;;  %p438_p8 = scmp.ne.s32.totalorder %s658_s29, %s437_s9  ;;  %s524_s13 = smov [#allocation5]  }
  0x40   : > { %s441_s15 = sshll.u32 %s524_s13, 4  ;;  %s442_s15 = int_to_ptr.vmem [resolvable:$false] %s441_s15 }
  0x41   : > { %p439_p11 = pnand %p438_p8, %p721_p9  ;;  %s443_s16 = scalar_lea.vmem %s442_s15, 256 }
  0x42   : > { %p444_p6 = scmp.lt.s32.totalorder %s658_s29, %s442_s15  ;;  %p445_p13 = scmp.lt.s32.totalorder %s443_s16, %s437_s9 }
  0x43   : > { %p440_p0 = pneg %p439_p11 }
  0x44   : > { %p446_p2 = por %p445_p13, %p444_p6 }
  0x46   : > { %p447_p5 = pnand %p446_p2, %p440_p0 }
  0x48   : > { %450 = shalt.err (!%p447_p5)
}
  0x49   : > { %s451_s17 = scalar_lea.hbm %s663_s5, 128  ;;  %s455_s24 = scalar_lea.hbm %s713_s1, 256 }
  0x4a   : > { %p452_p4 = scmp.ne.s32.totalorder %s663_s5, %s451_s17  ;;  %p456_p12 = scmp.lt.u32.totalorder %s663_s5, %s713_s1 }
  0x4b   : > { %p457_p1 = scmp.lt.u32.totalorder %s455_s24, %s451_s17  ;;  %p459_p8 = scmp.lt.u32.totalorder %s451_s17, %s663_s5 }
  0x4c   : > { %p453_p7 = pnand %p452_p4, %p721_p9 }
  0x4d   : > { %p458_p3 = por %p457_p1, %p456_p12 }
  0x4e   : > { %p454_p10 = pneg %p453_p7 }
  0x4f   : > { %p460_p11 = por %p459_p8, %p458_p3 }
  0x51   : > { %p461_p0 = pnand %p460_p11, %p454_p10 }
  0x53   : > { %464 = shalt.err (!%p461_p0)
}
  0x54   : > { %s525_s3 = smov 64   ;;  %s526_s4 = smov 4  }
  0x55   : > { %343 = dma.vmem_to_hbm [thread:$0]  (%p721_p9), %s658_s29, 128, %s663_s5, %s206_s12, %s525_s3, %s525_s3, %s526_s4  }
  0x56 PF: > { %s239_s27 = sand.u32 1, %s499_s6   ;;  %p722_p6 = scmp.ne.s32.totalorder %s718_s21, 0 }
  0x57   : > { %p723_p13 = scmp.ge.s32.totalorder %s519_s11, 2  ;;  %s240_s30 = scalar_lea.sflag [#allocation4], %s239_s27 }
  0x59   : > { %p350_p2 = pnand %p723_p13, %p722_p6 }
  0x5b   : > { %494 = dma.done.wait (!%p350_p2), %s240_s30, 128  }
  0x5c   : > { %496 = vsyncadd (!%p350_p2), %s240_s30, 4294967168  ;;  %s17_s11 = sadd.s32 1, %s519_s11   ;;  %s724_s6 = smov %s503_s7 }
  0x5d   : > { %p14_p5 = scmp.ge.s32.totalorder %s17_s11, 4   ;;  %s725_s7 = smov %s507_s8 }
  0x5e   : > { %s726_s8 = smov %s593_s20  ;;  %s727_s9 = smov %s515_s10 }
  0x5f   : > { %s728_s10 = smov %s730_s14  ;;  %16 = sbr.rel (!%p14_p5) target bundleno = 6 (0x6), region = 73 }
  0x66   :  { %245 = vsyncpa [#allocation3], 1 }
  0x67   :  { %247 = vsyncpa [#allocation3 + $0x1], 1 }
  0x68   :  { %248 = vsyncpa [#allocation4], 1 }
  0x69   :  { %250 = vsyncpa [#allocation4 + $0x1], 1 }

</bundles_post_ra>
